<compile_context>
chip_gen: v5e
topology: v5e:2x2
jax: 0.10.0
libtpu: 0.0.40
codegen_flags: <defaults>
</compile_context>

<pallas_src>
import functools

import jax
import jax.numpy as jnp
from jax.experimental import pallas as pl
from jax.experimental.pallas import tpu as pltpu


# ----------------------------------------------------------------------------
# helpers
# ----------------------------------------------------------------------------

def _round_up(x, m):
    return (x + m - 1) // m * m


def _pad_to(x, axis, mult):
    pad = (-x.shape[axis]) % mult
    if pad == 0:
        return x
    cfg = [(0, 0)] * x.ndim
    cfg[axis] = (0, pad)
    return jnp.pad(x, cfg)


# ----------------------------------------------------------------------------
# Pallas kernels
# ----------------------------------------------------------------------------

def _mm_kernel(*refs, relu, has_res):
    """Tiled matmul, K-accumulated in f32; bias (+ optional residual) + optional
    ReLU fused into the finalize step.  A/B are cast to bf16 for the MXU."""
    if has_res:
        a_ref, b_ref, bias_ref, res_ref, o_ref, acc_ref = refs
    else:
        a_ref, b_ref, bias_ref, o_ref, acc_ref = refs
        res_ref = None

    @pl.when(pl.program_id(2) == 0)
    def _():
        acc_ref[...] = jnp.zeros_like(acc_ref)

    acc_ref[...] += jnp.dot(a_ref[...].astype(jnp.bfloat16),
                            b_ref[...].astype(jnp.bfloat16),
                            preferred_element_type=jnp.float32)

    @pl.when(pl.program_id(2) == pl.num_programs(2) - 1)
    def _():
        y = acc_ref[...] + bias_ref[...]
        if res_ref is not None:
            y = y + res_ref[...]
        if relu:
            y = jnp.maximum(y, 0.0)
        o_ref[...] = y.astype(o_ref.dtype)


def _conv3x3_kernel(x_ref, w_ref, b_ref, o_ref, acc_ref, *, offsets, rows, relu):
    """Stride-1 3x3 conv: the padded image (flattened, per batch element) lives in VMEM;
    each of the 9 taps is a row-shifted static slice, accumulated in f32."""
    for t, off in enumerate(offsets):
        a = x_ref[off:off + rows, :].astype(jnp.bfloat16)
        contrib = jnp.dot(a, w_ref[t].astype(jnp.bfloat16),
                          preferred_element_type=jnp.float32)
        if t == 0:
            acc_ref[...] = contrib
        else:
            acc_ref[...] += contrib
    y = acc_ref[...] + b_ref[...]
    if relu:
        y = jnp.maximum(y, 0.0)
    o_ref[...] = y.astype(o_ref.dtype)


def _max_over_windows_kernel(x_ref, o_ref):
    # x_ref: (9, rows, 128) -> max over the 9 pooling-window taps
    o_ref[...] = jnp.max(x_ref[...], axis=0)


# ----------------------------------------------------------------------------
# wrappers
# ----------------------------------------------------------------------------

def pallas_matmul(a, b, bias=None, residual=None, *, relu=False,
                  out_dtype=jnp.float32, tm=None, tn=None, tk=None):
    """a:(M,K) @ b:(K,N) + bias (+ residual), optional ReLU.  bf16 MXU, f32 acc."""
    M, K = a.shape
    K2, N = b.shape
    assert K == K2
    tm = tm or (256 if M >= 1024 else 128)     # keep >=2 parallel M-tiles when M is small
    tn = tn or (256 if N >= 256 else 128)
    tk = tk or (256 if K > 128 else 128)
    if bias is None:
        bias = jnp.zeros((N,), jnp.float32)

    a_p = _pad_to(_pad_to(a, 0, tm), 1, tk)
    b_p = _pad_to(_pad_to(b, 0, tk), 1, tn)
    bias_p = _pad_to(bias.astype(jnp.float32).reshape(1, N), 1, tn)
    Mp, Kp = a_p.shape
    Np = b_p.shape[1]

    operands = [a_p, b_p, bias_p]
    in_specs = [
        pl.BlockSpec((tm, tk), lambda i, j, k: (i, k)),
        pl.BlockSpec((tk, tn), lambda i, j, k: (k, j)),
        pl.BlockSpec((1, tn), lambda i, j, k: (0, j)),
    ]
    has_res = residual is not None
    if has_res:
        res_p = _pad_to(_pad_to(residual.astype(jnp.float32), 0, tm), 1, tn)
        operands.append(res_p)
        in_specs.append(pl.BlockSpec((tm, tn), lambda i, j, k: (i, j)))

    out = pl.pallas_call(
        functools.partial(_mm_kernel, relu=relu, has_res=has_res),
        out_shape=jax.ShapeDtypeStruct((Mp, Np), out_dtype),
        grid_spec=pltpu.PrefetchScalarGridSpec(
            num_scalar_prefetch=0,
            grid=(Mp // tm, Np // tn, Kp // tk),
            in_specs=in_specs,
            out_specs=pl.BlockSpec((tm, tn), lambda i, j, k: (i, j)),
            scratch_shapes=[pltpu.VMEM((tm, tn), jnp.float32)],
        ),
        compiler_params=pltpu.CompilerParams(
            dimension_semantics=("parallel", "parallel", "arbitrary")),
    )(*operands)
    return out[:M, :N]


def pallas_conv3x3_s1(x, w, bias, *, relu=True, out_dtype=jnp.bfloat16):
    """3x3 / stride-1 / pad-1 conv (NHWC, eval-mode BN folded into bias).
    No im2col tensor ever hits HBM: the zero-padded image is flattened so every
    conv tap is a plain row-shifted slice of a single flat matrix; the conv output
    is computed at all padded positions and the border rows are discarded."""
    B, H, W, Cin = x.shape
    Cout = w.shape[-1]
    Hp, Wp = H + 2, W + 2
    Np = Hp * Wp
    rows = _round_up(Np, 8)
    total = _round_up(rows + 2 * Wp + 2, 8)

    # zero-padded image, flattened, with (Wp+1) extra zero rows on each side.
    # f32 here so the in-kernel row-shifted slices stay on the well-trodden 32-bit path.
    xp = jnp.pad(x.astype(jnp.float32), ((0, 0), (1, 1), (1, 1), (0, 0)))
    x2 = jnp.pad(xp.reshape(B, Np, Cin),
                 ((0, 0), (Wp + 1, total - Np - (Wp + 1)), (0, 0)))

    tn = min(256, _round_up(Cout, 128))
    w2 = _pad_to(w.reshape(9, Cin, Cout).astype(jnp.bfloat16), 2, tn)
    bias2 = _pad_to(bias.astype(jnp.float32).reshape(1, Cout), 1, tn)
    Cp = w2.shape[2]
    offsets = tuple(i * Wp + j for i in range(3) for j in range(3))

    out = pl.pallas_call(
        functools.partial(_conv3x3_kernel, offsets=offsets, rows=rows, relu=relu),
        out_shape=jax.ShapeDtypeStruct((B, rows, Cp), out_dtype),
        grid_spec=pltpu.PrefetchScalarGridSpec(
            num_scalar_prefetch=0,
            grid=(B, Cp // tn),
            in_specs=[
                pl.BlockSpec((None, total, Cin), lambda b, j: (b, 0, 0)),
                pl.BlockSpec((9, Cin, tn), lambda b, j: (0, 0, j)),
                pl.BlockSpec((1, tn), lambda b, j: (0, j)),
            ],
            out_specs=pl.BlockSpec((None, rows, tn), lambda b, j: (b, 0, j)),
            scratch_shapes=[pltpu.VMEM((rows, tn), jnp.float32)],
        ),
        compiler_params=pltpu.CompilerParams(
            dimension_semantics=("parallel", "parallel")),
    )(x2, w2, bias2)

    out = out[:, :Np, :Cout].reshape(B, Hp, Wp, Cout)
    return out[:, 1:Hp - 1, 1:Wp - 1, :]


def pallas_maxpool_3x3_s2(x, *, block_rows=512):
    """MaxPool2d(kernel=3, stride=2, padding=1) on NHWC input (stem only)."""
    B, H, W, C = x.shape
    Ho = (H + 2 - 3) // 2 + 1
    Wo = (W + 2 - 3) // 2 + 1
    neg = jnp.finfo(x.dtype).min
    xp = jnp.pad(x, ((0, 0), (1, 1), (1, 1), (0, 0)), constant_values=neg)
    wins = [xp[:, i:i + 2 * Ho:2, j:j + 2 * Wo:2, :]
            for i in range(3) for j in range(3)]
    n = B * Ho * Wo * C
    lanes = 128
    stk = jnp.stack(wins, axis=0).reshape(9, n)
    total = _round_up(n, lanes * block_rows)
    stk = jnp.pad(stk, ((0, 0), (0, total - n)), constant_values=neg)
    rows = total // lanes
    stk = stk.reshape(9, rows, lanes)            # lane-dense (128-wide) view for vst
    out = pl.pallas_call(
        _max_over_windows_kernel,
        out_shape=jax.ShapeDtypeStruct((rows, lanes), x.dtype),
        grid=(rows // block_rows,),
        in_specs=[pl.BlockSpec((9, block_rows, lanes), lambda i: (0, i, 0))],
        out_specs=pl.BlockSpec((block_rows, lanes), lambda i: (i, 0)),
    )(stk)
    return out.reshape(-1)[:n].reshape(B, Ho, Wo, C)


def conv2d_im2col(x, w, bias, *, stride=1, padding=0, relu=True,
                  out_dtype=jnp.float32):
    """Conv via im2col + Pallas MXU matmul.  Only used for the stem 7x7/s2, the two
    stride-2 3x3 convs, and all 1x1 convs (1x1 path is a plain reshape, no im2col)."""
    kh, kw, Cin, Cout = w.shape
    B, H, W, _ = x.shape
    if kh == 1 and kw == 1 and padding == 0:
        if stride > 1:
            x = x[:, ::stride, ::stride, :]
        _, Ho, Wo, _ = x.shape
        cols = x.reshape(B * Ho * Wo, Cin)
    else:
        xp = jnp.pad(x.astype(jnp.bfloat16),
                     ((0, 0), (padding, padding), (padding, padding), (0, 0)))
        Ho = (H + 2 * padding - kh) // stride + 1
        Wo = (W + 2 * padding - kw) // stride + 1
        patches = [xp[:, i:i + stride * Ho:stride, j:j + stride * Wo:stride, :]
                   for i in range(kh) for j in range(kw)]
        cols = jnp.concatenate(patches, axis=-1).reshape(B * Ho * Wo, kh * kw * Cin)
    out = pallas_matmul(cols, w.reshape(kh * kw * Cin, Cout), bias,
                        relu=relu, out_dtype=out_dtype)
    return out.reshape(B, Ho, Wo, Cout)


# ----------------------------------------------------------------------------
# SpatialEncoder: parameters + forward
# ----------------------------------------------------------------------------
# TODO(synk): pretrained ResNet-152 weights cannot be reproduced in-script; the backbone
# structure (conv1/bn/relu/maxpool + layer1..layer3 bottlenecks) is exact, weights are
# deterministic synthetic with eval-mode BatchNorm folded into the convs.

def init_spatial_encoder_params(hidden_size, key):
    keys = iter(jax.random.split(key, 512))

    def conv_w(kh, kw, cin, cout, gain=1.0):
        std = gain * (2.0 / (kh * kw * cin)) ** 0.5
        w = std * jax.random.normal(next(keys), (kh, kw, cin, cout), jnp.float32)
        return w.astype(jnp.bfloat16)

    def bottleneck(cin, width, cout, has_down):
        p = {
            "w1": conv_w(1, 1, cin, width), "b1": jnp.zeros((width,), jnp.float32),
            "w2": conv_w(3, 3, width, width), "b2": jnp.zeros((width,), jnp.float32),
            # small gain on the last conv keeps the 47-block residual stack tame
            "w3": conv_w(1, 1, width, cout, gain=0.2), "b3": jnp.zeros((cout,), jnp.float32),
        }
        if has_down:
            p["wd"] = conv_w(1, 1, cin, cout)
            p["bd"] = jnp.zeros((cout,), jnp.float32)
        return p

    def make_layer(cin, width, cout, n_blocks):
        blocks = [bottleneck(cin, width, cout, True)]
        for _ in range(n_blocks - 1):
            blocks.append(bottleneck(cout, width, cout, False))
        return blocks

    params = {
        "conv1_w": conv_w(7, 7, 3, 64),
        "conv1_b": jnp.zeros((64,), jnp.float32),
        "layer1": make_layer(64, 64, 256, 3),      # resnet152: 3 / 8 / 36
        "layer2": make_layer(256, 128, 512, 8),
        "layer3": make_layer(512, 256, 1024, 36),
        # nn.Linear(1024, hidden) with init_weights(): N(0, 0.02), bias 0.
        # stored pre-transposed as (1024, hidden) so no transpose at forward time.
        "mlp_w": (0.02 * jax.random.normal(next(keys), (hidden_size, 1024),
                                           jnp.float32)).T.astype(jnp.bfloat16),
        "mlp_b": jnp.zeros((hidden_size,), jnp.float32),
    }
    return params


def _bottleneck_forward(x, p, stride):
    # residual stream is kept in f32; conv intermediates are bf16
    if "wd" in p:
        identity = conv2d_im2col(x, p["wd"], p["bd"], stride=stride, padding=0,
                                 relu=False, out_dtype=jnp.float32)
    else:
        identity = x
    out = conv2d_im2col(x, p["w1"], p["b1"], stride=1, padding=0,
                        relu=True, out_dtype=jnp.float32)
    if stride == 1:
        out = pallas_conv3x3_s1(out, p["w2"], p["b2"], relu=True,
                                out_dtype=jnp.bfloat16)
    else:   # only the first block of layer2/layer3
        out = conv2d_im2col(out, p["w2"], p["b2"], stride=stride, padding=1,
                            relu=True, out_dtype=jnp.bfloat16)
    # w3 1x1 conv with the residual add + ReLU fused into the matmul finalize
    B, Ho, Wo, Cw = out.shape
    Cout = p["w3"].shape[-1]
    y = pallas_matmul(out.reshape(B * Ho * Wo, Cw),
                      p["w3"].reshape(Cw, Cout), p["b3"],
                      residual=identity.reshape(B * Ho * Wo, Cout),
                      relu=True, out_dtype=jnp.float32)
    return y.reshape(B, Ho, Wo, Cout)


def spatial_encoder_forward(params, img_nchw):
    """img_nchw: (B, 3, 224, 224) float32 (PyTorch layout).  Returns (B, 196, hidden)."""
    x = jnp.transpose(img_nchw, (0, 2, 3, 1)).astype(jnp.float32)   # NCHW -> NHWC
    # stem
    x = conv2d_im2col(x, params["conv1_w"], params["conv1_b"],
                      stride=2, padding=3, relu=True, out_dtype=jnp.bfloat16)
    x = pallas_maxpool_3x3_s2(x)
    # layers 1..3 (layer4 / avgpool / fc dropped, matching children()[:-3])
    for layer, stride in ((params["layer1"], 1),
                          (params["layer2"], 2),
                          (params["layer3"], 2)):
        for bi, blk in enumerate(layer):
            x = _bottleneck_forward(x, blk, stride if bi == 0 else 1)

    B, H, W, C = x.shape
    assert H * W == 196 and C == 1024, (H, W, C)
    # NHWC reshape (B, 196, 1024) == NCHW .view(B,1024,196).permute(0,2,1)
    feats = x.reshape(B * H * W, C)
    out = pallas_matmul(feats, params["mlp_w"], params["mlp_b"],
                        relu=False, out_dtype=jnp.float32)
    return out.reshape(B, H * W, -1)


# ----------------------------------------------------------------------------
if __name__ == "__main__":
    hidden_size = 32
    batch = 2
    key = jax.random.PRNGKey(0)
    k_param, k_img = jax.random.split(key)

    params = init_spatial_encoder_params(hidden_size, k_param)
    # 224x224 is required: the module hard-codes 196 = 14*14 spatial positions.
    img = jax.random.normal(k_img, (batch, 3, 224, 224), jnp.float32)

    out = spatial_encoder_forward(params, img)
    out = jax.block_until_ready(out)

    assert out.shape == (batch, 196, hidden_size), out.shape
    assert bool(jnp.all(jnp.isfinite(out)))
    print("KERNEL_OK")
</pallas_src>

<mosaic_0001>
module attributes {stable_mosaic.version = 11 : i64} {
  func.func @_mm_kernel(%arg0: i32, %arg1: i32, %arg2: i32, %arg3: memref<256x256xbf16, #tpu.memory_space<vmem>>, %arg4: memref<256x128xbf16, #tpu.memory_space<vmem>>, %arg5: memref<1x128xf32, #tpu.memory_space<vmem>>, %arg6: memref<256x128xbf16, #tpu.memory_space<vmem>>, %arg7: memref<256x128xf32, #tpu.memory_space<vmem>>) attributes {dimension_semantics = [#tpu.dimension_semantics<parallel>, #tpu.dimension_semantics<parallel>, #tpu.dimension_semantics<arbitrary>], iteration_bounds = array<i64: 98, 1, 1>, scalar_prefetch = 0 : i64, scratch_operands = 1 : i64, tpu.core_type = #tpu.core_type<tc>, window_params = [{transform_indices = @transform_0, window_bounds = array<i64: 256, 256>}, {transform_indices = @transform_1, window_bounds = array<i64: 256, 128>}, {transform_indices = @transform_2, window_bounds = array<i64: 1, 128>}, {transform_indices = @transform_3, window_bounds = array<i64: 256, 128>}]} {
    %c0_i32 = arith.constant 0 : i32
    %0 = arith.cmpi eq, %arg2, %c0_i32 : i32
    %1 = arith.extui %0 : i1 to i32
    %c0_i32_0 = arith.constant 0 : i32
    %2 = arith.cmpi ne, %1, %c0_i32_0 : i32
    scf.if %2 {
      %cst_10 = arith.constant 0.000000e+00 : f32
      %12 = vector.broadcast %cst_10 : f32 to vector<256x128xf32>
      %c0_11 = arith.constant 0 : index
      %c0_12 = arith.constant 0 : index
      %13 = vector.load %arg7[%c0_11, %c0_12] : memref<256x128xf32, #tpu.memory_space<vmem>>, vector<256x128xf32>
      tpu.vector_store %arg7[%c0_11, %c0_12], %12 {strides = array<i32>} : memref<256x128xf32, #tpu.memory_space<vmem>>, vector<256x128xf32>,
    } else {
    }
    %c0 = arith.constant 0 : index
    %c0_1 = arith.constant 0 : index
    %3 = vector.load %arg7[%c0, %c0_1] : memref<256x128xf32, #tpu.memory_space<vmem>>, vector<256x128xf32>
    %c0_2 = arith.constant 0 : index
    %c0_3 = arith.constant 0 : index
    %4 = vector.load %arg3[%c0_2, %c0_3] : memref<256x256xbf16, #tpu.memory_space<vmem>>, vector<256x256xbf16>
    %c0_4 = arith.constant 0 : index
    %c0_5 = arith.constant 0 : index
    %5 = vector.load %arg4[%c0_4, %c0_5] : memref<256x128xbf16, #tpu.memory_space<vmem>>, vector<256x128xbf16>
    %cst = arith.constant dense<0.000000e+00> : vector<256x128xf32>
    %6 = tpu.matmul %4, %5, %cst {dimension_numbers = #tpu.dot_dimension_numbers<[1], [0], [0], [1], [0, 0, 1, 1], [], []>} : vector<256x256xbf16>, vector<256x128xbf16>, vector<256x128xf32> -> vector<256x128xf32>
    %7 = arith.addf %3, %6 : vector<256x128xf32>
    %c0_6 = arith.constant 0 : index
    %c0_7 = arith.constant 0 : index
    %8 = vector.load %arg7[%c0_6, %c0_7] : memref<256x128xf32, #tpu.memory_space<vmem>>, vector<256x128xf32>
    tpu.vector_store %arg7[%c0_6, %c0_7], %7 {strides = array<i32>} : memref<256x128xf32, #tpu.memory_space<vmem>>, vector<256x128xf32>,
    %c0_i32_8 = arith.constant 0 : i32
    %9 = arith.cmpi eq, %arg2, %c0_i32_8 : i32
    %10 = arith.extui %9 : i1 to i32
    %c0_i32_9 = arith.constant 0 : i32
    %11 = arith.cmpi ne, %10, %c0_i32_9 : i32
    scf.if %11 {
      %c0_10 = arith.constant 0 : index
      %c0_11 = arith.constant 0 : index
      %12 = vector.load %arg7[%c0_10, %c0_11] : memref<256x128xf32, #tpu.memory_space<vmem>>, vector<256x128xf32>
      %c0_12 = arith.constant 0 : index
      %c0_13 = arith.constant 0 : index
      %13 = vector.load %arg5[%c0_12, %c0_13] : memref<1x128xf32, #tpu.memory_space<vmem>>, vector<1x128xf32>
      %14 = vector.broadcast %13 : vector<1x128xf32> to vector<256x128xf32>
      %15 = arith.addf %12, %14 : vector<256x128xf32>
      %cst_14 = arith.constant 0.000000e+00 : f32
      %16 = vector.broadcast %cst_14 : f32 to vector<256x128xf32>
      %17 = arith.maximumf %15, %16 : vector<256x128xf32>
      %18 = arith.truncf %17 : vector<256x128xf32> to vector<256x128xbf16>
      %c0_15 = arith.constant 0 : index
      %c0_16 = arith.constant 0 : index
      %19 = vector.load %arg6[%c0_15, %c0_16] : memref<256x128xbf16, #tpu.memory_space<vmem>>, vector<256x128xbf16>
      tpu.vector_store %arg6[%c0_15, %c0_16], %18 {strides = array<i32>} : memref<256x128xbf16, #tpu.memory_space<vmem>>, vector<256x128xbf16>,
    } else {
    }
    return
  }
  func.func @transform_0(%arg0: i32, %arg1: i32, %arg2: i32) -> (i32, i32) {
    %c0_i32 = arith.constant 0 : i32
    return %arg0, %arg2 : i32, i32
  }
  func.func @transform_1(%arg0: i32, %arg1: i32, %arg2: i32) -> (i32, i32) {
    %c0_i32 = arith.constant 0 : i32
    return %arg2, %arg1 : i32, i32
  }
  func.func @transform_2(%arg0: i32, %arg1: i32, %arg2: i32) -> (i32, i32) {
    %c0_i32 = arith.constant 0 : i32
    %c0_i32_0 = arith.constant 0 : i32
    return %c0_i32, %arg1 : i32, i32
  }
  func.func @transform_3(%arg0: i32, %arg1: i32, %arg2: i32) -> (i32, i32) {
    %c0_i32 = arith.constant 0 : i32
    return %arg0, %arg1 : i32, i32
  }
}

</mosaic_0001>

<bundles_post_ra>
// kernel: tpu_custom_call.1
= control target key start
LH: loop header
LB: loop body
LE: loop exit
PB: predicated region body
PF: predicated region fallthrough
CT: control target
= control target key end

     0   :  { %s2138_s0 = inlined_call_operand.hbm [shape: bf16[25088,256], index: 0, kind: input, shape index: {}]   ;;  %s2139_s1 = inlined_call_operand.hbm [shape: bf16[256,128], index: 1, kind: input, shape index: {}]   ;;  %s2140_s2 = inlined_call_operand.hbm [shape: f32[1,128], index: 2, kind: input, shape index: {}]   ;;  %s2141_s3 = inlined_call_operand.hbm [shape: bf16[25088,128], index: 3, kind: output, shape index: {}]  }
   0x1   :  { %2142 = sst [smem:[#allocation13_spill]] %s2139_s1 }
   0x2   :  { %8 = vsyncpa [#allocation4], 0 }
   0x3   :  { %10 = vsyncpa [#allocation4 + $0x1], 0 }
   0x4   :  { %11 = vsyncpa [#allocation7], 0 }
   0x5   :  { %12 = vsyncpa [#allocation5], 0 }
   0x6   :  { %14 = vsyncpa [#allocation5 + $0x1], 0  ;;  %s1866_s12 = smov 0   ;;  %s1868_s13 = smov 0  }
   0x7   :  { %s1870_s14 = smov 0   ;;  %s1872_s15 = smov 0  }
   0x8   :  { %s1874_s16 = smov 0   ;;  %s1876_s17 = smov 0  }
   0x9 LB: > { %s1196_s18 = sadd.s32 4294967295, %s1836_s17   ;;  %s1197_s19 = sadd.s32 4294967294, %s1836_s17   ;;  %s1836_s17 = sphi %s1876_s17, %s20_s17   ;;  %s1832_s16 = sphi %s1874_s16, %s2155_s16   ;;  %s1828_s15 = sphi %s1872_s15, %s2154_s15   ;;  %s1824_s14 = sphi %s1870_s14, %s2153_s14   ;;  %s1820_s13 = sphi %s1868_s13, %s2152_s13   ;;  %s1816_s12 = sphi %s1866_s12, %s2151_s12  }
   0xa   : > { %p61_p0 = scmp.ne.s32.totalorder %s1820_s13, %s1816_s12  ;;  %p1900_p1 = scmp.eq.s32.totalorder %s1196_s18, 0 }
   0xb   : > { %p1904_p2 = scmp.eq.s32.totalorder %s1196_s18, 97  ;;  %p147_p3 = scmp.eq.s32.totalorder %s1197_s19, 97 }
   0xc   : > { %p1910_p4 = por %p1900_p1, %p61_p0  ;;  %p1198_p5 = scmp.ge.s32.totalorder %s1836_s17, 1 }
   0xd   : > { %p1915_p6 = por %p147_p3, %p61_p0  ;;  %p154_p7 = scmp.lt.s32.totalorder %s1836_s17, 99 }
   0xe   : > { %s2147_s1 = sld [smem:[#allocation13_spill]]  ;;  %s1838_s28 = smov [#allocation6]  }
   0xf   : > { %p1923_p8 = pnand %p1198_p5, %p154_p7  ;;  %s171_s29 = sshll.u32 %s1838_s28, 4  ;;  %s172_s29 = int_to_ptr.vmem [resolvable:$true] %s171_s29 }
  0x10   : > { %s185_s5 = sshll.u32 %s2140_s2, 4  ;;  %s1839_s6 = smov 64   ;;  %s186_s5 = int_to_ptr.hbm [resolvable:$true] %s185_s5 }
  0x11   : > { %p1582_p9 = pneg %p1923_p8  ;;  %s1840_s7 = smov 4  }
  0x12   : > { %s1841_s8 = smov [#allocation8]   ;;  %s39_s10 = sadd.s32 1, %s1832_s16 }
  0x13   : > { %p1583_p10 = pnand %p1582_p9, %p1900_p1  ;;  %s187_s9 = sshll.u32 %s1841_s8, 4  ;;  %s188_s9 = int_to_ptr.vmem [resolvable:$true] %s187_s9 }
  0x14   : > { %s169_s26 = sshll.u32 %s2147_s1, 4  ;;  %s48_s11 = sadd.s32 1, %s1824_s14  ;;  %s170_s26 = int_to_ptr.hbm [resolvable:$true] %s169_s26 }
  0x15   : > { %1585 = dma.hbm_to_vmem [thread:$0]  (!%p1583_p10), %s170_s26, 2048, %s172_s29, [#allocation7], %s1839_s6, %s1839_s6, %s1840_s7  }
  0x16   : > { %1588 = dma.hbm_to_vmem [thread:$0]  (!%p1583_p10), %s186_s5, 16, %s188_s9, [#allocation7]  }
  0x17   : > { %p41_p11 = scmp.ge.s32.totalorder %s39_s10, 98  ;;  %p55_p12 = scmp.ne.s32.totalorder %s1824_s14, %s1820_s13 }
  0x18   : > { %p56_p13 = scmp.eq.s32.totalorder %s1836_s17, 0  ;;  %p1599_p0 = scmp.lt.s32.totalorder %s1836_s17, 98 }
  0x19   : > { %s2157_s10 = smov (%p41_p11, %s39_s10), 0  ;;  %p1948_p5 = por %p1904_p2, %p55_p12 }
  0x1a   : > { %p1942_p3 = por %p56_p13, %p55_p12  ;;  %s43_s24 = ssub.s32 %s1832_s16, %s2157_s10 }
  0x1b   : > { %s198_s25 = sand.u32 1, %s1824_s14   ;;  %p46_p7 = scmp.eq.s32.totalorder %s43_s24, 0 }
  0x1c   : > { %s1202_s26 = sshll.u32 %s198_s25, 8  ;;  %s1409_s28 = sshll.u32 %s1832_s16, 8 }
  0x1d   : > { %s1957_s29 = scalar_select %p46_p7, %s1824_s14, %s48_s11  }
  0x1e   : > { %s210_s5 = scalar_lea.hbm %s2138_s0, %s1409_s28  ;;  %s202_s7 = scalar_lea.vmem [#allocation3], %s1202_s26 }
  0x1f   : > { %s211_s6 = sshll.u32 %s210_s5, 4  ;;  %s213_s8 = sshll.u32 %s202_s7, 4  ;;  %s212_s6 = int_to_ptr.hbm [resolvable:$true] %s211_s6  ;;  %s214_s8 = int_to_ptr.vmem [resolvable:$true] %s213_s8 }
  0x20   : > { %p1590_p2 = pnand %p1599_p0, %p1942_p3  ;;  %s199_s21 = scalar_lea.sflag [#allocation4], %s198_s25 }
  0x21   : > { %s1842_s9 = smov 128   ;;  %s1843_s1 = smov 8  }
  0x22   : > { %1592 = dma.hbm_to_vmem [thread:$0]  (!%p1590_p2), %s212_s6, 4096, %s214_s8, %s199_s21, %s1842_s9, %s1842_s9, %s1843_s1  }
  0x23   : > { %225 = sbr.rel (%p1923_p8) target bundleno = 340 (0x154), region = 32  ;;  %s1969_s11 = sand.u32 (!%p1923_p8), 1, %s1820_s13  }
  0x24   : > { %s1207_s24 = sshll.u32 (!%p1923_p8), %s1969_s11, 8  ;;  %s228_s26 = scalar_lea.sflag (!%p1923_p8), [#allocation4], %s1969_s11 }
  0x25   : > { %s1973_s28 = scalar_lea.vmem (!%p1923_p8), [#allocation3], %s1207_s24 }
  0x28   : > { %1803 = dma.done.wait (%p1910_p4), %s228_s26, 4096  }
  0x29   : > { %1805 = vsyncadd (%p1910_p4), %s228_s26, 4294963200 }
  0x2a   : > { %1807 = dma.done.wait (%p1900_p1), [#allocation7], 2064  }
  0x2b   : > { %1809 = vsyncadd (%p1900_p1), [#allocation7], 4294965232  ;;  %v1449_v0 = vld [vmem:[#allocation6 + $0x38] sm:$0xff]  ;;  %v1448_v2 = vld [vmem:[#allocation6 + $0x30] sm:$0xff]  ;;  %s1210_s1 = sshll.u32 %s1969_s11, 7  ;;  %s1458_s22 = sshll.u32 %s1828_s15, 7 }
  0x2c   : > { %v1457_v1 = vld [vmem:[#allocation6 + $0x78] sm:$0xff]  ;;  %657 = vmatpush.bf16.msra.mxu0 %v1449_v0  ;;  %1554 = vmatpush.bf16.msra.mxu2 %v1449_v0  ;;  %v1456_v3 = vld [vmem:[#allocation6 + $0x70] sm:$0xff]  ;;  %v1447_v4 = vld [vmem:[#allocation6 + $0x28] sm:$0xff]  ;;  %s2053_s20 = scalar_lea.vmem [#allocation9], %s1210_s1  ;;  %s1079_s25 = scalar_lea.hbm %s2141_s3, %s1458_s22 }
  0x2d   : > { %746 = vmatpush.bf16.msra.mxu1 %v1457_v1  ;;  %1562 = vmatpush.bf16.msra.mxu3 %v1457_v1  ;;  %v1455_v5 = vld [vmem:[#allocation6 + $0x68] sm:$0xff]  ;;  %v1446_v6 = vld [vmem:[#allocation6 + $0x20] sm:$0xff]  ;;  %v1445_v8 = vld [vmem:[#allocation6 + $0x18] sm:$0xff]  ;;  %s1080_s30 = sshll.u32 %s2053_s20, 4  ;;  %s1082_s15 = sshll.u32 %s1079_s25, 4  ;;  %s1081_s30 = int_to_ptr.vmem [resolvable:$true] %s1080_s30  ;;  %s1083_s15 = int_to_ptr.hbm [resolvable:$true] %s1082_s15 }
  0x2e   : > { %v1454_v7 = vld [vmem:[#allocation6 + $0x60] sm:$0xff]  ;;  %v1453_v9 = vld [vmem:[#allocation6 + $0x58] sm:$0xff]  ;;  %v1444_v10 = vld [vmem:[#allocation6 + $0x10] sm:$0xff]  ;;  %s1067_s4 = scalar_lea.sflag [#allocation5], %s1969_s11  ;;  %s1764_s5 = sshra.s32 %s1083_s15, 4  ;;  %s1765_s5 = int_to_ptr.hbm [resolvable:$true] %s1764_s5 }
  0x2f   : > { %v1452_v11 = vld [vmem:[#allocation6 + $0x50] sm:$0xff]  ;;  %v1443_v12 = vld [vmem:[#allocation6 + $0x8] sm:$0xff]  ;;  %v1442_v14 = vld [vmem:[#allocation6] sm:$0xff]  ;;  %s1766_s6 = scalar_lea.hbm %s1765_s5, 128  ;;  %s1770_s21 = scalar_lea.hbm %s2141_s3, 12544 }
  0x30   : > { %658 = vmatpush.bf16.msra.mxu0 %v1448_v2  ;;  %1555 = vmatpush.bf16.msra.mxu2 %v1448_v2  ;;  %v1451_v13 = vld [vmem:[#allocation6 + $0x48] sm:$0xff]  ;;  %v1450_v15 = vld [vmem:[#allocation6 + $0x40] sm:$0xff]  ;;  %v1221_v28 = vld [vmem:[%s1973_s28 + $0x10] sm:$0xf]  ;;  %p1767_p1 = scmp.ne.s32.totalorder %s1765_s5, %s1766_s6  ;;  %p1771_p9 = scmp.lt.s32.totalorder %s1765_s5, %s2141_s3 }
  0x31   : > { %747 = vmatpush.bf16.msra.mxu1 %v1456_v3  ;;  %1563 = vmatpush.bf16.msra.mxu3 %v1456_v3  ;;  %v1213_v16 = vld [vmem:[%s1973_s28] sm:$0xf]  ;;  %v1411_v17 = vld [vmem:[%s1973_s28 + $0x4] sm:$0xf0]  ;;  %v1410_v20 = vld [vmem:[%s1973_s28 + $0x4] sm:$0xf]  ;;  %p1772_p10 = scmp.lt.s32.totalorder %s1770_s21, %s1766_s6 }
  0x32   : > { %v1277_v18 = vld [vmem:[%s1973_s28 + $0x80] sm:$0xf]  ;;  %v1427_v19 = vld [vmem:[%s1973_s28 + $0x84] sm:$0xf0]  ;;  %v1215_v21 = vld [vmem:[%s1973_s28 + $0x8] sm:$0xf0]  ;;  %v1214_v24 = vor.u32 %v1411_v17, %v1213_v16  ;;  %p1768_p4 = pnand %p1767_p1, %p1948_p5 }
  0x33   : > { %v1426_v22 = vld [vmem:[%s1973_s28 + $0x84] sm:$0xf]  ;;  %v1279_v23 = vld [vmem:[%s1973_s28 + $0x88] sm:$0xf0]  ;;  %v1278_v25 = vor.u32 %v1427_v19, %v1277_v18  ;;  %v1218_v26 = vor.u32 %v1410_v20, %v1215_v21  ;;  %v1413_v29 = vld [vmem:[%s1973_s28 + $0x14] sm:$0xf0]  ;;  %p1773_p11 = por %p1772_p10, %p1771_p9 }
  0x34   : > { %659 = vmatpush.bf16.msra.mxu0 %v1447_v4  ;;  %1556 = vmatpush.bf16.msra.mxu2 %v1447_v4  ;;  %v1282_v27 = vor.u32 %v1426_v22, %v1279_v23  ;;  %v1285_v30 = vld [vmem:[%s1973_s28 + $0x90] sm:$0xf]  ;;  %v1429_v31 = vld [vmem:[%s1973_s28 + $0x94] sm:$0xf0]  ;;  %v1412_v32 = vld [vmem:[%s1973_s28 + $0x14] sm:$0xf]  ;;  %v1222_v36 = vor.u32 %v1413_v29, %v1221_v28  ;;  %p1769_p8 = pneg %p1768_p4 }
  0x35   : > { %748 = vmatpush.bf16.msra.mxu1 %v1455_v5  ;;  %1564 = vmatpush.bf16.msra.mxu3 %v1455_v5  ;;  %v1223_v33 = vld [vmem:[%s1973_s28 + $0x18] sm:$0xf0]  ;;  %v1428_v34 = vld [vmem:[%s1973_s28 + $0x94] sm:$0xf]  ;;  %v1286_v37 = vor.u32 %v1429_v31, %v1285_v30  ;;  %v1229_v40 = vld [vmem:[%s1973_s28 + $0x20] sm:$0xf] }
  0x36   : > { %v1287_v35 = vld [vmem:[%s1973_s28 + $0x98] sm:$0xf0]  ;;  %v1226_v38 = vor.u32 %v1412_v32, %v1223_v33  ;;  %v1415_v41 = vld [vmem:[%s1973_s28 + $0x24] sm:$0xf0]  ;;  %v1293_v42 = vld [vmem:[%s1973_s28 + $0xa0] sm:$0xf]  ;;  %p1774_p12 = pnand %p1773_p11, %p1769_p8 }
  0x37   : > { %v1290_v39 = vor.u32 %v1428_v34, %v1287_v35  ;;  %v1431_v43 = vld [vmem:[%s1973_s28 + $0xa4] sm:$0xf0]  ;;  %v1414_v44 = vld [vmem:[%s1973_s28 + $0x24] sm:$0xf]  ;;  %v1231_v45 = vld [vmem:[%s1973_s28 + $0x28] sm:$0xf0]  ;;  %v1230_v48 = vor.u32 %v1415_v41, %v1229_v40 }
  0x38   : > { %660 = vmatpush.bf16.msra.mxu0 %v1446_v6  ;;  %1557 = vmatpush.bf16.msra.mxu2 %v1446_v6  ;;  %v1430_v46 = vld [vmem:[%s1973_s28 + $0xa4] sm:$0xf]  ;;  %v1295_v47 = vld [vmem:[%s1973_s28 + $0xa8] sm:$0xf0]  ;;  %v1294_v49 = vor.u32 %v1431_v43, %v1293_v42  ;;  %v1234_v50 = vor.u32 %v1414_v44, %v1231_v45  ;;  %v1237_v52 = vld [vmem:[%s1973_s28 + $0x30] sm:$0xf] }
  0x39   : > { %749 = vmatpush.bf16.msra.mxu1 %v1454_v7  ;;  %1565 = vmatpush.bf16.msra.mxu3 %v1454_v7  ;;  %v1298_v51 = vor.u32 %v1430_v46, %v1295_v47  ;;  %v1417_v53 = vld [vmem:[%s1973_s28 + $0x34] sm:$0xf0]  ;;  %v1301_v54 = vld [vmem:[%s1973_s28 + $0xb0] sm:$0xf]  ;;  %v1416_v56 = vld [vmem:[%s1973_s28 + $0x34] sm:$0xf] }
  0x3a   : > { %v1433_v55 = vld [vmem:[%s1973_s28 + $0xb4] sm:$0xf0]  ;;  %v1239_v57 = vld [vmem:[%s1973_s28 + $0x38] sm:$0xf0]  ;;  %v1432_v58 = vld [vmem:[%s1973_s28 + $0xb4] sm:$0xf]  ;;  %v1238_v60 = vor.u32 %v1417_v53, %v1237_v52 }
  0x3b   : > { %v1303_v59 = vld [vmem:[%s1973_s28 + $0xb8] sm:$0xf0]  ;;  %v1302_v61 = vor.u32 %v1433_v55, %v1301_v54  ;;  %v1242_v62 = vor.u32 %v1416_v56, %v1239_v57  ;;  %v1245_v0 = vld [vmem:[%s1973_s28 + $0x40] sm:$0xf]  ;;  %v1419_v1 = vld [vmem:[%s1973_s28 + $0x44] sm:$0xf0] }
  0x3c   : > { %661 = vmatpush.bf16.msra.mxu0 %v1445_v8  ;;  %1558 = vmatpush.bf16.msra.mxu2 %v1445_v8  ;;  %v1306_v63 = vor.u32 %v1432_v58, %v1303_v59  ;;  %v1309_v2 = vld [vmem:[%s1973_s28 + $0xc0] sm:$0xf]  ;;  %v1435_v3 = vld [vmem:[%s1973_s28 + $0xc4] sm:$0xf0]  ;;  %v1418_v4 = vld [vmem:[%s1973_s28 + $0x44] sm:$0xf]  ;;  %v1246_v8 = vor.u32 %v1419_v1, %v1245_v0 }
  0x3d   : > { %750 = vmatpush.bf16.msra.mxu1 %v1453_v9  ;;  %1566 = vmatpush.bf16.msra.mxu3 %v1453_v9  ;;  %v1247_v5 = vld [vmem:[%s1973_s28 + $0x48] sm:$0xf0]  ;;  %v1434_v6 = vld [vmem:[%s1973_s28 + $0xc4] sm:$0xf]  ;;  %v1310_v9 = vor.u32 %v1435_v3, %v1309_v2  ;;  %v1420_v16 = vld [vmem:[%s1973_s28 + $0x54] sm:$0xf] }
  0x3e   : > { %v1311_v7 = vld [vmem:[%s1973_s28 + $0xc8] sm:$0xf0]  ;;  %v1255_v17 = vld [vmem:[%s1973_s28 + $0x58] sm:$0xf0]  ;;  %v1436_v18 = vld [vmem:[%s1973_s28 + $0xd4] sm:$0xf] }
  0x3f   : > { %v1319_v19 = vld [vmem:[%s1973_s28 + $0xd8] sm:$0xf0]  ;;  %v1258_v22 = vor.u32 %v1420_v16, %v1255_v17  ;;  %v1422_v28 = vld [vmem:[%s1973_s28 + $0x64] sm:$0xf]  ;;  %v1263_v29 = vld [vmem:[%s1973_s28 + $0x68] sm:$0xf0] }
  0x40   : > { %662 = vmatpush.bf16.msra.mxu0 %v1444_v10  ;;  %1559 = vmatpush.bf16.msra.mxu2 %v1444_v10  ;;  %v1250_v10 = vor.u32 %v1418_v4, %v1247_v5  ;;  %v1322_v23 = vor.u32 %v1436_v18, %v1319_v19  ;;  %v1438_v30 = vld [vmem:[%s1973_s28 + $0xe4] sm:$0xf]  ;;  %v1327_v31 = vld [vmem:[%s1973_s28 + $0xe8] sm:$0xf0]  ;;  %v1266_v34 = vor.u32 %v1422_v28, %v1263_v29  ;;  %v1424_v40 = vld [vmem:[%s1973_s28 + $0x74] sm:$0xf] }
  0x41   : > { %751 = vmatpush.bf16.msra.mxu1 %v1452_v11  ;;  %1567 = vmatpush.bf16.msra.mxu3 %v1452_v11  ;;  %v1314_v11 = vor.u32 %v1434_v6, %v1311_v7  ;;  %v1330_v35 = vor.u32 %v1438_v30, %v1327_v31  ;;  %v1271_v41 = vld [vmem:[%s1973_s28 + $0x78] sm:$0xf0]  ;;  %v1440_v42 = vld [vmem:[%s1973_s28 + $0xf4] sm:$0xf] }
  0x42   : > { %v1335_v43 = vld [vmem:[%s1973_s28 + $0xf8] sm:$0xf0]  ;;  %v1274_v46 = vor.u32 %v1424_v40, %v1271_v41 }
  0x43   : > { %v1338_v47 = vor.u32 %v1440_v42, %v1335_v43 }
  0x44   : > { %663 = vmatpush.bf16.msra.mxu0 %v1443_v12  ;;  %1560 = vmatpush.bf16.msra.mxu2 %v1443_v12  ;;  %v1253_v12 = vld [vmem:[%s1973_s28 + $0x50] sm:$0xf] }
  0x45   : > { %752 = vmatpush.bf16.msra.mxu1 %v1451_v13  ;;  %1568 = vmatpush.bf16.msra.mxu3 %v1451_v13  ;;  %v1421_v13 = vld [vmem:[%s1973_s28 + $0x54] sm:$0xf0] }
  0x46   : > { %v1254_v20 = vor.u32 %v1421_v13, %v1253_v12 }
  0x48   : > { %664 = vmatpush.bf16.msra.mxu0 %v1442_v14  ;;  %1561 = vmatpush.bf16.msra.mxu2 %v1442_v14  ;;  %v1317_v14 = vld [vmem:[%s1973_s28 + $0xd0] sm:$0xf] }
  0x49   : > { %753 = vmatpush.bf16.msra.mxu1 %v1450_v15  ;;  %1569 = vmatpush.bf16.msra.mxu3 %v1450_v15  ;;  %v1437_v15 = vld [vmem:[%s1973_s28 + $0xd4] sm:$0xf0] }
  0x4a   : > { %v1318_v21 = vor.u32 %v1437_v15, %v1317_v14 }
  0x4b   : > { %665 = vmatmul.bf16.vlgmr.msra.gmra.mxu0 %v1214_v24  ;;  %705 = vmatmul.bf16.vlgmr.msra.gmra.mxu2 %v1278_v25  ;;  %v1261_v24 = vld [vmem:[%s1973_s28 + $0x60] sm:$0xf]  ;;  %v1423_v25 = vld [vmem:[%s1973_s28 + $0x64] sm:$0xf0] }
  0x4c   : > { %754 = vmatmul.bf16.vlgmr.msra.gmra.mxu1 %v1218_v26  ;;  %794 = vmatmul.bf16.vlgmr.msra.gmra.mxu3 %v1282_v27  ;;  %v1325_v26 = vld [vmem:[%s1973_s28 + $0xe0] sm:$0xf]  ;;  %v1439_v27 = vld [vmem:[%s1973_s28 + $0xe4] sm:$0xf0]  ;;  %v1262_v32 = vor.u32 %v1423_v25, %v1261_v24 }
  0x4d   : > { %v1326_v33 = vor.u32 %v1439_v27, %v1325_v26 }
  0x5b   : > { %670 = vmatmul.bf16.gmra.mxu0 %v1222_v36  ;;  %710 = vmatmul.bf16.gmra.mxu2 %v1286_v37  ;;  %v1269_v36 = vld [vmem:[%s1973_s28 + $0x70] sm:$0xf]  ;;  %v1425_v37 = vld [vmem:[%s1973_s28 + $0x74] sm:$0xf0] }
  0x5c   : > { %759 = vmatmul.bf16.gmra.mxu1 %v1226_v38  ;;  %799 = vmatmul.bf16.gmra.mxu3 %v1290_v39  ;;  %v1333_v38 = vld [vmem:[%s1973_s28 + $0xf0] sm:$0xf]  ;;  %v1441_v39 = vld [vmem:[%s1973_s28 + $0xf4] sm:$0xf0]  ;;  %v1270_v44 = vor.u32 %v1425_v37, %v1269_v36 }
  0x5d   : > { %v1334_v45 = vor.u32 %v1441_v39, %v1333_v38 }
  0x6b   : > { %675 = vmatmul.bf16.gmra.mxu0 %v1230_v48  ;;  %715 = vmatmul.bf16.gmra.mxu2 %v1294_v49 }
  0x6c   : > { %764 = vmatmul.bf16.gmra.mxu1 %v1234_v50  ;;  %804 = vmatmul.bf16.gmra.mxu3 %v1298_v51  ;;  %v2047_v51 = vld [vmem:[#allocation8] ss:$0 sm:$0xff] }
  0x7b   : > { %680 = vmatmul.bf16.gmra.mxu0 %v1238_v60  ;;  %720 = vmatmul.bf16.gmra.mxu2 %v1302_v61 }
  0x7c   : > { %769 = vmatmul.bf16.gmra.mxu1 %v1242_v62  ;;  %809 = vmatmul.bf16.gmra.mxu3 %v1306_v63 }
  0x8b   : > { %685 = vmatmul.bf16.gmra.mxu0 %v1246_v8  ;;  %725 = vmatmul.bf16.gmra.mxu2 %v1310_v9 }
  0x8c   : > { %774 = vmatmul.bf16.gmra.mxu1 %v1250_v10  ;;  %814 = vmatmul.bf16.gmra.mxu3 %v1314_v11 }
  0x9b   : > { %690 = vmatmul.bf16.gmra.mxu0 %v1254_v20  ;;  %730 = vmatmul.bf16.gmra.mxu2 %v1318_v21 }
  0x9c   : > { %779 = vmatmul.bf16.gmra.mxu1 %v1258_v22  ;;  %819 = vmatmul.bf16.gmra.mxu3 %v1322_v23 }
  0xab   : > { %695 = vmatmul.bf16.gmra.mxu0 %v1262_v32  ;;  %735 = vmatmul.bf16.gmra.mxu2 %v1326_v33 }
  0xac   : > { %784 = vmatmul.bf16.gmra.mxu1 %v1266_v34  ;;  %824 = vmatmul.bf16.gmra.mxu3 %v1330_v35 }
  0xbb   : > { %700 = vmatmul.bf16.gmra.mxu0 %v1270_v44  ;;  %740 = vmatmul.bf16.gmra.mxu2 %v1334_v45 }
  0xbc   : > { %789 = vmatmul.bf16.gmra.mxu1 %v1274_v46  ;;  %829 = vmatmul.bf16.gmra.mxu3 %v1338_v47 }
  0xc8   : > { %v666_v48 = vpop.f32.mrf.mxu0 }
  0xc9   : > { %v755_v49 = vpop.f32.mrf.mxu1 }
  0xca   : > { %v756_v50 = vadd.f32 %v755_v49, %v666_v48 }
  0xcc   : > { %v938_v56 = vadd.f32 %v2047_v51, %v756_v50 }
  0xce   : > { %v706_v52 = vpop.f32.mrf.mxu2  ;;  %v970_v60 = vmax.f32 %v938_v56, 0.0 }
  0xcf   : > { %v795_v53 = vpop.f32.mrf.mxu3 }
  0xd0   : > { %v668_v54 = vpop.f32.mrf.mxu0  ;;  %v796_v58 = vadd.f32 %v795_v53, %v706_v52 }
  0xd1   : > { %v757_v55 = vpop.f32.mrf.mxu1 }
  0xd2   : > { %v758_v57 = vadd.f32 %v757_v55, %v668_v54  ;;  %v954_v0 = vadd.f32 %v2047_v51, %v796_v58 }
  0xd4   : > { %v939_v59 = vadd.f32 %v2047_v51, %v758_v57  ;;  %v986_v6 = vmax.f32 %v954_v0, 0.0 }
  0xd6   : > { %v971_v61 = vmax.f32 %v939_v59, 0.0  ;;  %v708_v62 = vpop.f32.mrf.mxu2 }
  0xd7   : > { %v797_v63 = vpop.f32.mrf.mxu3 }
  0xd8   : > { %v1462_v1 = vpack.c.bf16 %v971_v61, %v970_v60  ;;  %v798_v2 = vadd.f32 %v797_v63, %v708_v62  ;;  %v671_v3 = vpop.f32.mrf.mxu0 }
  0xd9   : > { %v760_v4 = vpop.f32.mrf.mxu1 }
  0xda   : > { %1463 = vst [vmem:[%s2053_s20] sm:$0xff] %v1462_v1   ;;  %v955_v5 = vadd.f32 %v2047_v51, %v798_v2  ;;  %v761_v9 = vadd.f32 %v760_v4, %v671_v3 }
  0xdc   : > { %v987_v7 = vmax.f32 %v955_v5, 0.0  ;;  %v940_v14 = vadd.f32 %v2047_v51, %v761_v9 }
  0xde   : > { %v1502_v8 = vpack.c.bf16 %v987_v7, %v986_v6  ;;  %v711_v10 = vpop.f32.mrf.mxu2  ;;  %v972_v18 = vmax.f32 %v940_v14, 0.0 }
  0xdf   : > { %v800_v11 = vpop.f32.mrf.mxu3 }
  0xe0   : > { %1546 = vst [vmem:[%s2053_s20 + $0x40] sm:$0xff] %v1502_v8   ;;  %v673_v12 = vpop.f32.mrf.mxu0  ;;  %v801_v16 = vadd.f32 %v800_v11, %v711_v10 }
  0xe1   : > { %v762_v13 = vpop.f32.mrf.mxu1 }
  0xe2   : > { %v763_v15 = vadd.f32 %v762_v13, %v673_v12  ;;  %v956_v22 = vadd.f32 %v2047_v51, %v801_v16 }
  0xe4   : > { %v941_v17 = vadd.f32 %v2047_v51, %v763_v15  ;;  %v988_v28 = vmax.f32 %v956_v22, 0.0 }
  0xe6   : > { %v973_v19 = vmax.f32 %v941_v17, 0.0  ;;  %v713_v20 = vpop.f32.mrf.mxu2 }
  0xe7   : > { %v802_v21 = vpop.f32.mrf.mxu3 }
  0xe8   : > { %v1467_v23 = vpack.c.bf16 %v973_v19, %v972_v18  ;;  %v803_v24 = vadd.f32 %v802_v21, %v713_v20  ;;  %v676_v25 = vpop.f32.mrf.mxu0 }
  0xe9   : > { %v765_v26 = vpop.f32.mrf.mxu1 }
  0xea   : > { %1539 = vst [vmem:[%s2053_s20 + $0x8] sm:$0xff] %v1467_v23   ;;  %v957_v27 = vadd.f32 %v2047_v51, %v803_v24  ;;  %v766_v31 = vadd.f32 %v765_v26, %v676_v25 }
  0xec   : > { %v989_v29 = vmax.f32 %v957_v27, 0.0  ;;  %v942_v36 = vadd.f32 %v2047_v51, %v766_v31 }
  0xee   : > { %v1507_v30 = vpack.c.bf16 %v989_v29, %v988_v28  ;;  %v716_v32 = vpop.f32.mrf.mxu2  ;;  %v974_v40 = vmax.f32 %v942_v36, 0.0 }
  0xef   : > { %v805_v33 = vpop.f32.mrf.mxu3 }
  0xf0   : > { %1547 = vst [vmem:[%s2053_s20 + $0x48] sm:$0xff] %v1507_v30   ;;  %v678_v34 = vpop.f32.mrf.mxu0  ;;  %v806_v38 = vadd.f32 %v805_v33, %v716_v32 }
  0xf1   : > { %v767_v35 = vpop.f32.mrf.mxu1 }
  0xf2   : > { %v768_v37 = vadd.f32 %v767_v35, %v678_v34  ;;  %v958_v44 = vadd.f32 %v2047_v51, %v806_v38 }
  0xf4   : > { %v943_v39 = vadd.f32 %v2047_v51, %v768_v37  ;;  %v990_v50 = vmax.f32 %v958_v44, 0.0 }
  0xf6   : > { %v975_v41 = vmax.f32 %v943_v39, 0.0  ;;  %v718_v42 = vpop.f32.mrf.mxu2 }
  0xf7   : > { %v807_v43 = vpop.f32.mrf.mxu3 }
  0xf8   : > { %v1472_v45 = vpack.c.bf16 %v975_v41, %v974_v40  ;;  %v808_v46 = vadd.f32 %v807_v43, %v718_v42  ;;  %v681_v47 = vpop.f32.mrf.mxu0 }
  0xf9   : > { %v770_v48 = vpop.f32.mrf.mxu1 }
  0xfa   : > { %1540 = vst [vmem:[%s2053_s20 + $0x10] sm:$0xff] %v1472_v45   ;;  %v959_v49 = vadd.f32 %v2047_v51, %v808_v46  ;;  %v771_v54 = vadd.f32 %v770_v48, %v681_v47 }
  0xfc   : > { %v991_v52 = vmax.f32 %v959_v49, 0.0  ;;  %v944_v59 = vadd.f32 %v2047_v51, %v771_v54 }
  0xfe   : > { %v1512_v53 = vpack.c.bf16 %v991_v52, %v990_v50  ;;  %v721_v55 = vpop.f32.mrf.mxu2  ;;  %v976_v63 = vmax.f32 %v944_v59, 0.0 }
  0xff   : > { %v810_v56 = vpop.f32.mrf.mxu3 }
 0x100   : > { %1548 = vst [vmem:[%s2053_s20 + $0x50] sm:$0xff] %v1512_v53   ;;  %v683_v57 = vpop.f32.mrf.mxu0  ;;  %v811_v61 = vadd.f32 %v810_v56, %v721_v55 }
 0x101   : > { %v772_v58 = vpop.f32.mrf.mxu1 }
 0x102   : > { %v773_v60 = vadd.f32 %v772_v58, %v683_v57  ;;  %v960_v3 = vadd.f32 %v2047_v51, %v811_v61 }
 0x104   : > { %v945_v62 = vadd.f32 %v2047_v51, %v773_v60  ;;  %v992_v9 = vmax.f32 %v960_v3, 0.0 }
 0x106   : > { %v977_v0 = vmax.f32 %v945_v62, 0.0  ;;  %v723_v1 = vpop.f32.mrf.mxu2 }
 0x107   : > { %v812_v2 = vpop.f32.mrf.mxu3 }
 0x108   : > { %v1477_v4 = vpack.c.bf16 %v977_v0, %v976_v63  ;;  %v813_v5 = vadd.f32 %v812_v2, %v723_v1  ;;  %v686_v6 = vpop.f32.mrf.mxu0 }
 0x109   : > { %v775_v7 = vpop.f32.mrf.mxu1 }
 0x10a   : > { %1541 = vst [vmem:[%s2053_s20 + $0x18] sm:$0xff] %v1477_v4   ;;  %v961_v8 = vadd.f32 %v2047_v51, %v813_v5  ;;  %v776_v12 = vadd.f32 %v775_v7, %v686_v6 }
 0x10c   : > { %v993_v10 = vmax.f32 %v961_v8, 0.0  ;;  %v946_v17 = vadd.f32 %v2047_v51, %v776_v12 }
 0x10e   : > { %v1517_v11 = vpack.c.bf16 %v993_v10, %v992_v9  ;;  %v726_v13 = vpop.f32.mrf.mxu2  ;;  %v978_v21 = vmax.f32 %v946_v17, 0.0 }
 0x10f   : > { %v815_v14 = vpop.f32.mrf.mxu3 }
 0x110   : > { %1549 = vst [vmem:[%s2053_s20 + $0x58] sm:$0xff] %v1517_v11   ;;  %v688_v15 = vpop.f32.mrf.mxu0  ;;  %v816_v19 = vadd.f32 %v815_v14, %v726_v13 }
 0x111   : > { %v777_v16 = vpop.f32.mrf.mxu1 }
 0x112   : > { %v778_v18 = vadd.f32 %v777_v16, %v688_v15  ;;  %v962_v25 = vadd.f32 %v2047_v51, %v816_v19 }
 0x114   : > { %v947_v20 = vadd.f32 %v2047_v51, %v778_v18  ;;  %v994_v31 = vmax.f32 %v962_v25, 0.0 }
 0x116   : > { %v979_v22 = vmax.f32 %v947_v20, 0.0  ;;  %v728_v23 = vpop.f32.mrf.mxu2 }
 0x117   : > { %v817_v24 = vpop.f32.mrf.mxu3 }
 0x118   : > { %v1482_v26 = vpack.c.bf16 %v979_v22, %v978_v21  ;;  %v818_v27 = vadd.f32 %v817_v24, %v728_v23  ;;  %v691_v28 = vpop.f32.mrf.mxu0 }
 0x119   : > { %v780_v29 = vpop.f32.mrf.mxu1 }
 0x11a   : > { %1542 = vst [vmem:[%s2053_s20 + $0x20] sm:$0xff] %v1482_v26   ;;  %v963_v30 = vadd.f32 %v2047_v51, %v818_v27  ;;  %v781_v34 = vadd.f32 %v780_v29, %v691_v28 }
 0x11c   : > { %v995_v32 = vmax.f32 %v963_v30, 0.0  ;;  %v948_v39 = vadd.f32 %v2047_v51, %v781_v34 }
 0x11e   : > { %v1522_v33 = vpack.c.bf16 %v995_v32, %v994_v31  ;;  %v731_v35 = vpop.f32.mrf.mxu2  ;;  %v980_v43 = vmax.f32 %v948_v39, 0.0 }
 0x11f   : > { %v820_v36 = vpop.f32.mrf.mxu3 }
 0x120   : > { %1550 = vst [vmem:[%s2053_s20 + $0x60] sm:$0xff] %v1522_v33   ;;  %v693_v37 = vpop.f32.mrf.mxu0  ;;  %v821_v41 = vadd.f32 %v820_v36, %v731_v35 }
 0x121   : > { %v782_v38 = vpop.f32.mrf.mxu1 }
 0x122   : > { %v783_v40 = vadd.f32 %v782_v38, %v693_v37  ;;  %v964_v47 = vadd.f32 %v2047_v51, %v821_v41 }
 0x124   : > { %v949_v42 = vadd.f32 %v2047_v51, %v783_v40  ;;  %v996_v54 = vmax.f32 %v964_v47, 0.0 }
 0x126   : > { %v981_v44 = vmax.f32 %v949_v42, 0.0  ;;  %v733_v45 = vpop.f32.mrf.mxu2 }
 0x127   : > { %v822_v46 = vpop.f32.mrf.mxu3 }
 0x128   : > { %v1487_v48 = vpack.c.bf16 %v981_v44, %v980_v43  ;;  %v823_v49 = vadd.f32 %v822_v46, %v733_v45  ;;  %v696_v50 = vpop.f32.mrf.mxu0 }
 0x129   : > { %v785_v52 = vpop.f32.mrf.mxu1 }
 0x12a   : > { %1543 = vst [vmem:[%s2053_s20 + $0x28] sm:$0xff] %v1487_v48   ;;  %v965_v53 = vadd.f32 %v2047_v51, %v823_v49  ;;  %v786_v57 = vadd.f32 %v785_v52, %v696_v50 }
 0x12c   : > { %v997_v55 = vmax.f32 %v965_v53, 0.0  ;;  %v950_v62 = vadd.f32 %v2047_v51, %v786_v57 }
 0x12e   : > { %v1527_v56 = vpack.c.bf16 %v997_v55, %v996_v54  ;;  %v736_v58 = vpop.f32.mrf.mxu2  ;;  %v982_v2 = vmax.f32 %v950_v62, 0.0 }
 0x12f   : > { %v825_v59 = vpop.f32.mrf.mxu3 }
 0x130   : > { %1551 = vst [vmem:[%s2053_s20 + $0x68] sm:$0xff] %v1527_v56   ;;  %v698_v60 = vpop.f32.mrf.mxu0  ;;  %v826_v0 = vadd.f32 %v825_v59, %v736_v58 }
 0x131   : > { %v787_v61 = vpop.f32.mrf.mxu1 }
 0x132   : > { %v788_v63 = vadd.f32 %v787_v61, %v698_v60  ;;  %v966_v6 = vadd.f32 %v2047_v51, %v826_v0 }
 0x134   : > { %v951_v1 = vadd.f32 %v2047_v51, %v788_v63  ;;  %v998_v12 = vmax.f32 %v966_v6, 0.0 }
 0x136   : > { %v983_v3 = vmax.f32 %v951_v1, 0.0  ;;  %v738_v4 = vpop.f32.mrf.mxu2 }
 0x137   : > { %v827_v5 = vpop.f32.mrf.mxu3 }
 0x138   : > { %v1492_v7 = vpack.c.bf16 %v983_v3, %v982_v2  ;;  %v828_v8 = vadd.f32 %v827_v5, %v738_v4  ;;  %v701_v9 = vpop.f32.mrf.mxu0 }
 0x139   : > { %v790_v10 = vpop.f32.mrf.mxu1 }
 0x13a   : > { %1544 = vst [vmem:[%s2053_s20 + $0x30] sm:$0xff] %v1492_v7   ;;  %v967_v11 = vadd.f32 %v2047_v51, %v828_v8  ;;  %v791_v15 = vadd.f32 %v790_v10, %v701_v9 }
 0x13c   : > { %v999_v13 = vmax.f32 %v967_v11, 0.0  ;;  %v952_v20 = vadd.f32 %v2047_v51, %v791_v15 }
 0x13e   : > { %v1532_v14 = vpack.c.bf16 %v999_v13, %v998_v12  ;;  %v741_v16 = vpop.f32.mrf.mxu2  ;;  %v984_v24 = vmax.f32 %v952_v20, 0.0 }
 0x13f   : > { %v830_v17 = vpop.f32.mrf.mxu3 }
 0x140   : > { %1552 = vst [vmem:[%s2053_s20 + $0x70] sm:$0xff] %v1532_v14   ;;  %v703_v18 = vpop.f32.mrf.mxu0  ;;  %v831_v22 = vadd.f32 %v830_v17, %v741_v16 }
 0x141   : > { %v792_v19 = vpop.f32.mrf.mxu1 }
 0x142   : > { %v793_v21 = vadd.f32 %v792_v19, %v703_v18  ;;  %v968_v28 = vadd.f32 %v2047_v51, %v831_v22 }
 0x144   : > { %v953_v23 = vadd.f32 %v2047_v51, %v793_v21  ;;  %v1000_v32 = vmax.f32 %v968_v28, 0.0 }
 0x146   : > { %v985_v25 = vmax.f32 %v953_v23, 0.0  ;;  %v743_v26 = vpop.f32.mrf.mxu2 }
 0x147   : > { %v832_v27 = vpop.f32.mrf.mxu3 }
 0x148   : > { %v1497_v29 = vpack.c.bf16 %v985_v25, %v984_v24  ;;  %v833_v30 = vadd.f32 %v832_v27, %v743_v26 }
 0x14a   : > { %1545 = vst [vmem:[%s2053_s20 + $0x38] sm:$0xff] %v1497_v29   ;;  %v969_v31 = vadd.f32 %v2047_v51, %v833_v30 }
 0x14c   : > { %v1001_v33 = vmax.f32 %v969_v31, 0.0 }
 0x14e   : > { %v1537_v34 = vpack.c.bf16 %v1001_v33, %v1000_v32 }
 0x150   : > { %1553 = vst [vmem:[%s2053_s20 + $0x78] sm:$0xff] %v1537_v34  }
 0x151   : > { %1777 = shalt.err (!%p1774_p12)
}
 0x152   : > { %s1844_s11 = smov 64   ;;  %s1845_s26 = smov 4  }
 0x153   : > { %1580 = dma.vmem_to_hbm [thread:$0]  (%p1948_p5), %s1081_s30, 2048, %s1083_s15, %s1067_s4, %s1844_s11, %s1844_s11, %s1845_s26  }
 0x154 PF: > { %p1602_p13 = scmp.ge.s32.totalorder %s1836_s17, 2  ;;  %s1097_s28 = sand.u32 1, %s1816_s12  }
 0x155   : > { %s1098_s1 = scalar_lea.sflag [#allocation5], %s1097_s28 }
 0x156   : > { %p1594_p0 = pnand %p1602_p13, %p1915_p6 }
 0x158   : > { %p1595_p3 = pneg %p1594_p0 }
 0x15a   : > { %1811 = dma.done.wait (%p1595_p3), %s1098_s1, 2048  }
 0x15b   : > { %1813 = vsyncadd (%p1595_p3), %s1098_s1, 4294965248  ;;  %s20_s17 = sadd.s32 1, %s1836_s17   ;;  %s2151_s12 = smov %s1820_s13 }
 0x15c   : > { %p17_p7 = scmp.ge.s32.totalorder %s20_s17, 100   ;;  %s2152_s13 = smov %s1824_s14 }
 0x15d   : > { %s2153_s14 = smov %s1957_s29  ;;  %s2154_s15 = smov %s1832_s16 }
 0x15e   : > { %s2155_s16 = smov %s2157_s10  ;;  %19 = sbr.rel (!%p17_p7) target bundleno = 9 (0x9), region = 95 }
 0x163   :  { %1104 = vsyncpa [#allocation4], 1 }
 0x164   :  { %1106 = vsyncpa [#allocation4 + $0x1], 1 }
 0x165   :  { %1107 = vsyncpa [#allocation7], 1 }
 0x166   :  { %1108 = vsyncpa [#allocation5], 1 }
 0x167   :  { %1110 = vsyncpa [#allocation5 + $0x1], 1 }

</bundles_post_ra>
